<compile_context>
chip_gen: v7x
topology: tpu7x:2x2x1
jax: 0.10.0
libtpu: 0.0.40
codegen_flags: <defaults>
</compile_context>

<pallas_src>
import jax
import jax.numpy as jnp
from jax.experimental import pallas as pl
from jax.experimental.pallas import tpu as pltpu


def ca_kernel(x_ref, w1t_ref, b1_ref, w2_ref, b2_ref, out_ref):
    # x_ref : (1, C, HW)  one image: channels on sublanes, pixels on lanes
    # w1t   : (C, Cr)     fc1 weight (C -> Cr), pre-transposed in the wrapper
    # b1    : (1, Cr)
    # w2    : (C, Cr)     fc2 weight (Cr -> C)
    # b2    : (C, 1)
    x = x_ref[0]                                                   # (C, HW) f32
    hw = x.shape[1]

    # ---- squeeze: global average pool over spatial (lane reduction) ----
    pooled = jnp.sum(x, axis=1, keepdims=True) * (1.0 / hw)        # (C, 1)

    # ---- excite: fc1 -> ReLU -> fc2 -> sigmoid, all on VPU/XLU ----
    # z[r] = sum_c W1[r, c] * pooled[c]   (sublane reduction over C)
    z = jnp.sum(w1t_ref[...] * pooled, axis=0, keepdims=True) + b1_ref[...]   # (1, Cr)
    z = jnp.maximum(z, 0.0)
    # s[c] = sigmoid(sum_r W2[c, r] * z[r])   (lane reduction over Cr)
    s = jax.nn.sigmoid(
        jnp.sum(w2_ref[...] * z, axis=1, keepdims=True) + b2_ref[...])        # (C, 1)

    # ---- scale: per-channel attention applied to the full image ----
    out_ref[0] = (x * s).astype(out_ref.dtype)


def ca_forward(x_nchw, params):
    """x_nchw: (B, C, H, W) float32.  params follow the PyTorch Conv2d layout."""
    B, C, H, W = x_nchw.shape
    Cr = params["wf1"].shape[0]
    HW = H * W

    # glue: free view on x + tiny weight reshapes (no spatial relayout anywhere)
    x = x_nchw.reshape(B, C, HW)
    w1t = jnp.transpose(params["wf1"][:, :, 0, 0], (1, 0))          # (C, Cr)
    b1 = params["bf1"].reshape(1, Cr)
    w2 = params["wf2"][:, :, 0, 0]                                  # (C, Cr)
    b2 = params["bf2"].reshape(C, 1)

    def full(shape):
        return pl.BlockSpec(shape, lambda b, _n=len(shape): (0,) * _n)

    out = pl.pallas_call(
        ca_kernel,
        out_shape=jax.ShapeDtypeStruct((B, C, HW), x.dtype),
        grid=(B,),
        in_specs=[
            pl.BlockSpec((1, C, HW), lambda b: (b, 0, 0)),
            full((C, Cr)),
            full((1, Cr)),
            full((C, Cr)),
            full((C, 1)),
        ],
        out_specs=pl.BlockSpec((1, C, HW), lambda b: (b, 0, 0)),
        compiler_params=pltpu.CompilerParams(
            dimension_semantics=("parallel",),        # batch -> both TCs on v7x
            vmem_limit_bytes=32 * 1024 * 1024,        # safe headroom on v5e's 16 MiB default
        ),
    )(x, w1t, b1, w2, b2)

    return out.reshape(B, C, H, W)


def ca_reference(x, p):
    """Pure-JAX reference mirroring the PyTorch CALayer (NCHW)."""
    dn = ("NCHW", "OIHW", "NCHW")
    hi = jax.lax.Precision.HIGHEST
    w = jnp.mean(x, axis=(2, 3), keepdims=True)
    w = jax.lax.conv_general_dilated(w, p["wf1"], (1, 1), "SAME",
                                     dimension_numbers=dn, precision=hi)
    w = jnp.maximum(w + p["bf1"][None, :, None, None], 0.0)
    w = jax.lax.conv_general_dilated(w, p["wf2"], (1, 1), "SAME",
                                     dimension_numbers=dn, precision=hi)
    w = jax.nn.sigmoid(w + p["bf2"][None, :, None, None])
    return x * w


if __name__ == "__main__":
    B, C, H, W = 2, 32, 16, 16
    reduction = 16
    Cr = C // reduction

    key = jax.random.PRNGKey(0)
    ks = jax.random.split(key, 5)
    params = {
        "wf1": 0.1 * jax.random.normal(ks[0], (Cr, C, 1, 1), jnp.float32),
        "bf1": 0.01 * jax.random.normal(ks[1], (Cr,), jnp.float32),
        "wf2": 0.1 * jax.random.normal(ks[2], (C, Cr, 1, 1), jnp.float32),
        "bf2": 0.01 * jax.random.normal(ks[3], (C,), jnp.float32),
    }
    x = jax.random.normal(ks[4], (B, C, H, W), jnp.float32)

    out = jax.block_until_ready(ca_forward(x, params))
    ref = jax.block_until_ready(ca_reference(x, params))

    assert out.shape == x.shape and out.dtype == x.dtype
    assert jnp.allclose(out, ref, rtol=1e-3, atol=1e-3), (
        float(jnp.max(jnp.abs(out - ref))))
    print("KERNEL_OK")
</pallas_src>

<mosaic_0001>
module attributes {stable_mosaic.version = 11 : i64} {
  func.func @ca_kernel(%arg0: i32, %arg1: memref<1x32x256xf32, #tpu.memory_space<vmem>>, %arg2: memref<32x2xf32, #tpu.memory_space<vmem>>, %arg3: memref<1x2xf32, #tpu.memory_space<vmem>>, %arg4: memref<32x2xf32, #tpu.memory_space<vmem>>, %arg5: memref<32x1xf32, #tpu.memory_space<vmem>>, %arg6: memref<1x32x256xf32, #tpu.memory_space<vmem>>) attributes {dimension_semantics = [#tpu.dimension_semantics<parallel>], iteration_bounds = array<i64: 2>, scalar_prefetch = 0 : i64, scratch_operands = 0 : i64, tpu.core_type = #tpu.core_type<tc>, window_params = [{transform_indices = @transform_0, window_bounds = array<i64: 1, 32, 256>}, {pipeline_mode = #tpu.pipeline_mode<synchronous>, transform_indices = @transform_1, window_bounds = array<i64: 32, 2>}, {pipeline_mode = #tpu.pipeline_mode<synchronous>, transform_indices = @transform_2, window_bounds = array<i64: 1, 2>}, {pipeline_mode = #tpu.pipeline_mode<synchronous>, transform_indices = @transform_3, window_bounds = array<i64: 32, 2>}, {pipeline_mode = #tpu.pipeline_mode<synchronous>, transform_indices = @transform_4, window_bounds = array<i64: 32, 1>}, {transform_indices = @transform_5, window_bounds = array<i64: 1, 32, 256>}]} {
    %c0 = arith.constant 0 : index
    %c0_0 = arith.constant 0 : index
    %c0_1 = arith.constant 0 : index
    %0 = vector.load %arg1[%c0, %c0_0, %c0_1] : memref<1x32x256xf32, #tpu.memory_space<vmem>>, vector<1x32x256xf32>
    %1 = vector.shape_cast %0 : vector<1x32x256xf32> to vector<32x256xf32>
    %cst = arith.constant dense<0.000000e+00> : vector<32xf32>
    %2 = vector.multi_reduction <add>, %1, %cst [1] : vector<32x256xf32> to vector<32xf32>
    %3 = vector.shape_cast %2 : vector<32xf32> to vector<32x1xf32>
    %cst_2 = arith.constant 3.906250e-03 : f32
    %4 = vector.broadcast %cst_2 : f32 to vector<32x1xf32>
    %5 = arith.mulf %3, %4 : vector<32x1xf32>
    %c0_3 = arith.constant 0 : index
    %c0_4 = arith.constant 0 : index
    %6 = vector.load %arg2[%c0_3, %c0_4] : memref<32x2xf32, #tpu.memory_space<vmem>>, vector<32x2xf32>
    %7 = vector.broadcast %5 : vector<32x1xf32> to vector<32x2xf32>
    %8 = arith.mulf %6, %7 : vector<32x2xf32>
    %cst_5 = arith.constant dense<0.000000e+00> : vector<2xf32>
    %9 = vector.multi_reduction <add>, %8, %cst_5 [0] : vector<32x2xf32> to vector<2xf32>
    %10 = vector.shape_cast %9 : vector<2xf32> to vector<1x2xf32>
    %c0_6 = arith.constant 0 : index
    %c0_7 = arith.constant 0 : index
    %11 = vector.load %arg3[%c0_6, %c0_7] : memref<1x2xf32, #tpu.memory_space<vmem>>, vector<1x2xf32>
    %12 = arith.addf %10, %11 : vector<1x2xf32>
    %cst_8 = arith.constant 0.000000e+00 : f32
    %13 = vector.broadcast %cst_8 : f32 to vector<1x2xf32>
    %14 = arith.maximumf %12, %13 : vector<1x2xf32>
    %c0_9 = arith.constant 0 : index
    %c0_10 = arith.constant 0 : index
    %15 = vector.load %arg4[%c0_9, %c0_10] : memref<32x2xf32, #tpu.memory_space<vmem>>, vector<32x2xf32>
    %16 = vector.broadcast %14 : vector<1x2xf32> to vector<32x2xf32>
    %17 = arith.mulf %15, %16 : vector<32x2xf32>
    %cst_11 = arith.constant dense<0.000000e+00> : vector<32xf32>
    %18 = vector.multi_reduction <add>, %17, %cst_11 [1] : vector<32x2xf32> to vector<32xf32>
    %19 = vector.shape_cast %18 : vector<32xf32> to vector<32x1xf32>
    %c0_12 = arith.constant 0 : index
    %c0_13 = arith.constant 0 : index
    %20 = vector.load %arg5[%c0_12, %c0_13] : memref<32x1xf32, #tpu.memory_space<vmem>>, vector<32x1xf32>
    %21 = arith.addf %19, %20 : vector<32x1xf32>
    %22 = arith.negf %21 : vector<32x1xf32>
    %23 = math.exp %22 : vector<32x1xf32>
    %cst_14 = arith.constant 1.000000e+00 : f32
    %24 = vector.broadcast %cst_14 : f32 to vector<32x1xf32>
    %25 = arith.addf %24, %23 : vector<32x1xf32>
    %26 = arith.divf %24, %25 : vector<32x1xf32>
    %27 = vector.broadcast %26 : vector<32x1xf32> to vector<32x256xf32>
    %28 = arith.mulf %1, %27 : vector<32x256xf32>
    %c0_15 = arith.constant 0 : index
    %c0_16 = arith.constant 0 : index
    %c0_17 = arith.constant 0 : index
    %29 = vector.load %arg6[%c0_15, %c0_16, %c0_17] : memref<1x32x256xf32, #tpu.memory_space<vmem>>, vector<1x32x256xf32>
    %30 = vector.shape_cast %29 : vector<1x32x256xf32> to vector<32x256xf32>
    %31 = vector.shape_cast %28 : vector<32x256xf32> to vector<1x32x256xf32>
    tpu.vector_store %arg6[%c0_15, %c0_16, %c0_17], %31 {strides = array<i32>} : memref<1x32x256xf32, #tpu.memory_space<vmem>>, vector<1x32x256xf32>,
    return
  }
  func.func @transform_0(%arg0: i32) -> (i32, i32, i32) {
    %c0_i32 = arith.constant 0 : i32
    %c0_i32_0 = arith.constant 0 : i32
    %c0_i32_1 = arith.constant 0 : i32
    return %arg0, %c0_i32, %c0_i32_0 : i32, i32, i32
  }
  func.func @transform_1(%arg0: i32) -> (i32, i32) {
    %c0_i32 = arith.constant 0 : i32
    %c0_i32_0 = arith.constant 0 : i32
    %c0_i32_1 = arith.constant 0 : i32
    return %c0_i32, %c0_i32_0 : i32, i32
  }
  func.func @transform_2(%arg0: i32) -> (i32, i32) {
    %c0_i32 = arith.constant 0 : i32
    %c0_i32_0 = arith.constant 0 : i32
    %c0_i32_1 = arith.constant 0 : i32
    return %c0_i32, %c0_i32_0 : i32, i32
  }
  func.func @transform_3(%arg0: i32) -> (i32, i32) {
    %c0_i32 = arith.constant 0 : i32
    %c0_i32_0 = arith.constant 0 : i32
    %c0_i32_1 = arith.constant 0 : i32
    return %c0_i32, %c0_i32_0 : i32, i32
  }
  func.func @transform_4(%arg0: i32) -> (i32, i32) {
    %c0_i32 = arith.constant 0 : i32
    %c0_i32_0 = arith.constant 0 : i32
    %c0_i32_1 = arith.constant 0 : i32
    return %c0_i32, %c0_i32_0 : i32, i32
  }
  func.func @transform_5(%arg0: i32) -> (i32, i32, i32) {
    %c0_i32 = arith.constant 0 : i32
    %c0_i32_0 = arith.constant 0 : i32
    %c0_i32_1 = arith.constant 0 : i32
    return %arg0, %c0_i32, %c0_i32_0 : i32, i32, i32
  }
}

</mosaic_0001>

<bundles_post_ra>
// kernel: tpu_custom_call.1
= control target key start
LH: loop header
LB: loop body
LE: loop exit
PB: predicated region body
PF: predicated region fallthrough
CT: control target
= control target key end

     0   :  { %10 = vsyncpa [#allocation3], 0  ;;  %s940_s0 = inlined_call_operand.hbm [shape: f32[2,32,256], index: 0, kind: input, shape index: {}]   ;;  %s941_s1 = inlined_call_operand.vmem [shape: f32[32,2], index: 1, kind: input, shape index: {}]   ;;  %s942_s2 = inlined_call_operand.vmem [shape: f32[1,2], index: 2, kind: input, shape index: {}]   ;;  %s943_s3 = inlined_call_operand.vmem [shape: f32[32,2], index: 3, kind: input, shape index: {}]   ;;  %s944_s4 = inlined_call_operand.vmem [shape: f32[32,1], index: 4, kind: input, shape index: {}]   ;;  %s945_s5 = inlined_call_operand.hbm [shape: f32[2,32,256], index: 5, kind: output, shape index: {}]  }
   0x1   :  { %12 = vsyncpa [#allocation3 + $0x1], 0 }
   0x2   :  { %13 = vsyncpa [#allocation4], 0 }
   0x3   :  { %15 = vsyncpa [#allocation4 + $0x1], 0  ;;  %s695_s18 = smov 0   ;;  %s697_s19 = smov 0  }
   0x4   :  { %s699_s20 = smov 0   ;;  %s701_s21 = smov 0  }
   0x5 LB: > { %s716_s22 = sadd.s32 4294967295, %s656_s21   ;;  %s471_s23 = sadd.s32 4294967294, %s656_s21   ;;  %s656_s21 = sphi %s701_s21, %s958_s21   ;;  %s652_s20 = sphi %s699_s20, %s957_s20   ;;  %s648_s19 = sphi %s697_s19, %s956_s19   ;;  %s644_s18 = sphi %s695_s18, %s955_s18  }
   0x6   : > { %s720_s24 = sadd.s32 1, %s656_s21   ;;  %s28_s25 = sadd.s32 1, %s652_s20 }
   0x7   : > { %s25_s26 = ssub.s32 %s656_s21, %s720_s24  ;;  %p35_p0 = scmp.ne.s32.totalorder %s652_s20, %s648_s19 }
   0x8   : > { %p26_p1 = scmp.eq.s32.totalorder %s25_s26, 0  ;;  %p36_p2 = scmp.eq.s32.totalorder %s656_s21, 0 }
   0x9   : > { %p41_p3 = scmp.ne.s32.totalorder %s648_s19, %s644_s18  ;;  %p42_p4 = scmp.eq.s32.totalorder %s716_s22, 0 }
   0xa   : > { %s732_s27 = scalar_select %p26_p1, %s652_s20, %s28_s25  }
   0xb   : > { %p734_p5 = por %p36_p2, %p35_p0  ;;  %p738_p6 = por %p42_p4, %p41_p3 }
   0xc   : > { %p149_p7 = scmp.eq.s32.totalorder %s716_s22, 1  ;;  %p155_p8 = scmp.eq.s32.totalorder %s471_s23, 1 }
   0xd   : > { %p503_p10 = scmp.lt.s32.totalorder %s656_s21, 2  ;;  %s187_s7 = sand.u32 1, %s652_s20  }
   0xe   : > { %p745_p11 = por %p149_p7, %p35_p0  ;;  %p749_p12 = por %p155_p8, %p41_p3 }
   0xf   : > { %s489_s8 = sshll.u32 %s656_s21, 10  ;;  %s474_s9 = sshll.u32 %s187_s7, 6 }
  0x10   : > { %s949_s30 = scalar_select %p745_p11, 1, 0 }
  0x11   : > { %s950_s6 = scalar_select %p749_p12, 1, 0 }
  0x12   : > { %s758_s12 = scalar_lea.hbm %s940_s0, %s489_s8  ;;  %s191_s13 = scalar_lea.vmem [#allocation2], %s474_s9 }
  0x13   : > { %s198_s14 = sshll.u32 %s191_s13, 4  ;;  %p762_p13 = pnand %p503_p10, %p734_p5  ;;  %s766_s14 = int_to_ptr.vmem [resolvable:$true] %s198_s14 }
  0x14   : > { %s768_s16 = scalar_lea.sflag [#allocation3], %s187_s7  ;;  %s560_s17 = scalar_lea.hbm %s758_s12, 1024 }
  0x15   : > { %p561_p0 = scmp.ne.s32.totalorder %s758_s12, %s560_s17  ;;  %p562_p1 = pneg %p762_p13 }
  0x16   : > { %s565_s26 = scalar_lea.hbm %s940_s0, 2048  ;;  %p566_p4 = scmp.lt.u32.totalorder %s758_s12, %s940_s0 }
  0x17   : > { %p563_p2 = pnand %p562_p1, %p561_p0  ;;  %p567_p5 = scmp.lt.u32.totalorder %s565_s26, %s560_s17 }
  0x18   : > { %p569_p8 = scmp.lt.u32.totalorder %s560_s17, %s758_s12 }
  0x19   : > { %p564_p3 = pneg %p563_p2  ;;  %p568_p7 = por %p567_p5, %p566_p4 }
  0x1b   : > { %p570_p10 = por %p569_p8, %p568_p7 }
  0x1d   : > { %p571_p9 = pnand %p570_p10, %p564_p3 }
  0x1f   : > { %574 = shalt.err (!%p571_p9)
}
  0x20   : > { %s575_s7 = scalar_lea.vmem %s766_s14, 1024  ;;  %s658_s9 = smov [#allocation2]  }
  0x21   : > { %p576_p0 = scmp.ne.s32.totalorder %s766_s14, %s575_s7  ;;  %s580_s10 = sshll.u32 %s658_s9, 4  ;;  %s581_s10 = int_to_ptr.vmem [resolvable:$false] %s580_s10 }
  0x22   : > { %s582_s11 = scalar_lea.vmem %s581_s10, 2048  ;;  %p583_p11 = scmp.lt.s32.totalorder %s766_s14, %s581_s10 }
  0x23   : > { %p578_p2 = pnand %p576_p0, %p562_p1  ;;  %p584_p4 = scmp.lt.s32.totalorder %s582_s11, %s575_s7 }
  0x25   : > { %p579_p12 = pneg %p578_p2  ;;  %p585_p5 = por %p584_p4, %p583_p11 }
  0x27   : > { %p586_p7 = pnand %p585_p5, %p579_p12 }
  0x29   : > { %589 = shalt.err (!%p586_p7)
}
  0x2a   : > { %s659_s13 = smov 256   ;;  %s660_s17 = smov 16  }
  0x2b   : > { %498 = dma.hbm_to_vmem [thread:$0]  (!%p762_p13), %s758_s12, 1024, %s766_s14, %s768_s16, %s659_s13, %s659_s13, %s660_s17  }
  0x2c   : > { %p477_p9 = scmp.ge.s32.totalorder %s656_s21, 1  ;;  %p206_p1 = scmp.lt.s32.totalorder %s656_s21, 3 }
  0x2e   : > { %p207_p3 = pnand %p477_p9, %p206_p1 }
  0x2f   : > { %s799_s23 = sand.u32 (!%p207_p3), 1, %s648_s19  }
  0x30   : > { %210 = sbr.rel (%p207_p3) target bundleno = 561 (0x231), region = 40  ;;  %s478_s25 = sshll.u32 (!%p207_p3), %s799_s23, 6 }
  0x31   : > { %s213_s26 = scalar_lea.sflag (!%p207_p3), [#allocation3], %s799_s23  ;;  %s216_s28 = scalar_lea.vmem (!%p207_p3), [#allocation2], %s478_s25 }
  0x37   : > { %635 = dma.done.wait (%p738_p6), %s213_s26, 1024  }
  0x38   : > { %637 = vsyncadd (%p738_p6), %s213_s26, 4294966272  ;;  %v809_v0 = vld [vmem:[%s216_s28] sm:$0xff]  ;;  %v811_v1 = vld [vmem:[%s216_s28 + $0x8] sm:$0xff]  ;;  %vm275_vm0 = vcmask 15360   ;;  %v296_v38 = vlaneseq  ;;  %v661_v60 = vmov 0   ;;  %s242_s26 = scalar_lea.vmem [#allocation5], %s478_s25 }
  0x39   : > { %v813_v2 = vld [vmem:[%s216_s28 + $0x20] sm:$0xff]  ;;  %v251_v3 = vadd.f32 %v811_v1, %v809_v0  ;;  %v817_v4 = vld [vmem:[%s216_s28 + $0x28] sm:$0xff]  ;;  %v819_v5 = vld [vmem:[%s216_s28 + $0x10] sm:$0xff]  ;;  %543 = vset.pattern.permute.xlu1 %v661_v60  ;;  %542 = vset.pattern.permute.xlu0 %v661_v60  ;;  %s490_s29 = sshll.u32 %s716_s22, 10  ;;  %s385_s22 = scalar_lea.sflag [#allocation4], %s799_s23 }
  0x3a   : > { %v821_v6 = vld [vmem:[%s216_s28 + $0x18] sm:$0xff]  ;;  %v257_v7 = vadd.f32 %v817_v4, %v813_v2  ;;  %v825_v8 = vld [vmem:[%s216_s28 + $0x30] sm:$0xff]  ;;  %v267_v15 = vld [vmem:[%s941_s1] sm:$0xff]  ;;  %v297_v41 = vshrl.u32 %v296_v38, 7  ;;  %s894_s14 = scalar_lea.hbm %s945_s5, %s490_s29  ;;  %p952_p11 = scmp.ne.s32.totalorder %s949_s30, 0 }
  0x3b   : > { %v827_v9 = vld [vmem:[%s216_s28 + $0x38] sm:$0xff]  ;;  %252 = vadd.xlane.f32.xlu0 %v251_v3  ;;  %v254_v10 = vadd.f32 %v821_v6, %v819_v5  ;;  %v269_v17 = vld [vmem:[%s941_s1 + $0x10] sm:$0xff]  ;;  %v268_v18 = vld [vmem:[%s941_s1 + $0x8] sm:$0xff]  ;;  %s398_s28 = sshll.u32 %s242_s26, 4  ;;  %s662_s16 = smov [#allocation5]   ;;  %s889_s28 = int_to_ptr.vmem [resolvable:$true] %s398_s28 }
  0x3c   : > { %258 = vadd.xlane.f32.xlu1 %v257_v7  ;;  %v260_v11 = vadd.f32 %v827_v9, %v825_v8  ;;  %v270_v22 = vld [vmem:[%s941_s1 + $0x18] sm:$0xff]  ;;  %v289_v42 = vld [vmem:[%s942_s2] sm:$0x1]  ;;  %v298_v45 = vsub.s32 0, %v297_v41  ;;  %v293_v47 = vld [vmem:[%s943_s3 + $0x8] sm:$0xff]  ;;  %s590_s15 = scalar_lea.vmem %s889_s28, 1024 }
  0x3d   : > { %v292_v48 = vld [vmem:[%s943_s3] sm:$0xff]  ;;  %v295_v50 = vld [vmem:[%s943_s3 + $0x18] sm:$0xff]  ;;  %v294_v51 = vld [vmem:[%s943_s3 + $0x10] sm:$0xff]  ;;  %p591_p6 = scmp.ne.s32.totalorder %s889_s28, %s590_s15  ;;  %s594_s8 = sshll.u32 %s662_s16, 4  ;;  %s595_s8 = int_to_ptr.vmem [resolvable:$false] %s594_s8 }
  0x3e   : > { %v317_v61 = vld [vmem:[%s944_s4 + $0x8] sm:$0xff]  ;;  %v316_v62 = vld [vmem:[%s944_s4] sm:$0xff]  ;;  %s596_s7 = scalar_lea.vmem %s595_s8, 2048  ;;  %p597_p8 = scmp.lt.s32.totalorder %s889_s28, %s595_s8 }
  0x3f   : > { %255 = vadd.xlane.f32.xlu0 %v254_v10  ;;  %p592_p12 = pnand %p591_p6, %p952_p11  ;;  %p598_p10 = scmp.lt.s32.totalorder %s596_s7, %s590_s15 }
  0x40   : > { %261 = vadd.xlane.f32.xlu1 %v260_v11  ;;  %v319_v11 = vld [vmem:[%s944_s4 + $0x18] sm:$0xff] }
  0x41   : > { %p593_p13 = pneg %p592_p12  ;;  %p599_p0 = por %p598_p10, %p597_p8 }
  0x43   : > { %p600_p2 = pnand %p599_p0, %p593_p13 }
  0xc8   : > { %v253_v12 = vpop.xlane.xlu0 %252 }
  0xc9   : > { %v263_v13 = vmul.f32 0.00390625, %v253_v12  ;;  %v259_v14 = vpop.xlane.xlu1 %258  ;;  %v318_v12 = vld [vmem:[%s944_s4 + $0x10] sm:$0xff] }
  0xca   : > { %v265_v16 = vmul.f32 0.00390625, %v259_v14 }
  0xcb   : > { %v271_v20 = vmul.f32 %v267_v15, %v263_v13 }
  0xcc   : > { %v256_v19 = vpop.xlane.xlu0 %255  ;;  %v273_v25 = vmul.f32 %v269_v17, %v265_v16 }
  0xcd   : > { %v264_v21 = vmul.f32 0.00390625, %v256_v19  ;;  %v262_v23 = vpop.xlane.xlu1 %261  ;;  %v276_v28 = vsel %vm275_vm0, %v271_v20, 0.0 }
  0xce   : > { %v266_v24 = vmul.f32 0.00390625, %v262_v23  ;;  %v279_v31 = vsel %vm275_vm0, %v273_v25, 0.0 }
  0xcf   : > { %v272_v26 = vmul.f32 %v268_v18, %v264_v21 }
  0xd0   : > { %v274_v27 = vmul.f32 %v270_v22, %v266_v24 }
  0xd1   : > { %v277_v29 = vsel %vm275_vm0, %v272_v26, 0.0 }
  0xd2   : > { %v278_v30 = vadd.f32 %v277_v29, %v276_v28  ;;  %v281_v32 = vsel %vm275_vm0, %v274_v27, 0.0 }
  0xd4   : > { %v280_v33 = vadd.f32 %v279_v31, %v278_v30 }
  0xd6   : > { %v282_v34 = vadd.f32 %v281_v32, %v280_v33 }
  0xd8   : > { %v283_v35 = vrot.slane %v282_v34, 4 }
  0xda   : > { %v284_v36 = vadd.f32 %v283_v35, %v282_v34 }
  0xdc   : > { %v285_v37 = vrot.slane %v284_v36, 2 }
  0xde   : > { %v286_v39 = vadd.f32 %v285_v37, %v284_v36 }
  0xe0   : > { %v287_v40 = vrot.slane %v286_v39, 1 }
  0xe2   : > { %v288_v43 = vadd.f32 %v287_v40, %v286_v39 }
  0xe4   : > { %v290_v44 = vadd.f32 %v289_v42, %v288_v43 }
  0xe6   : > { %v291_v46 = vmax.f32 %v290_v44, 0.0 }
  0xe8   : > { %v299_v49 = vrot.slane %v291_v46, %v298_v45 }
  0xea   : > { %v301_v52 = vmul.f32 %v299_v49, %v293_v47  ;;  %v300_v53 = vmul.f32 %v299_v49, %v292_v48  ;;  %v303_v56 = vmul.f32 %v299_v49, %v295_v50  ;;  %v302_v57 = vmul.f32 %v299_v49, %v294_v51 }
  0xec   : > { %v307_v54 = vsel %vm275_vm0, %v301_v52, 0.0  ;;  %v304_v55 = vsel %vm275_vm0, %v300_v53, 0.0  ;;  %v313_v58 = vsel %vm275_vm0, %v303_v56, 0.0  ;;  %v310_v59 = vsel %vm275_vm0, %v302_v57, 0.0 }
  0xed   : > { %308 = vadd.xlane.f32.xlu1 %v307_v54  ;;  %305 = vadd.xlane.f32.xlu0 %v304_v55 }
  0xf1   : > { %314 = vadd.xlane.f32.xlu1 %v313_v58  ;;  %311 = vadd.xlane.f32.xlu0 %v310_v59 }
 0x17a   : > { %v309_v63 = vpop.xlane.xlu1 %308  ;;  %v306_v3 = vpop.xlane.xlu0 %305 }
 0x17b   : > { %v321_v7 = vadd.f32 %v317_v61, %v309_v63  ;;  %v320_v10 = vadd.f32 %v316_v62, %v306_v3 }
 0x17d   : > { %v481_v13 = vmul.f32 -1.442695, %v321_v7  ;;  %v480_v14 = vmul.f32 -1.442695, %v320_v10 }
 0x17e   : > { %v315_v15 = vpop.xlane.xlu1 %314  ;;  %v312_v16 = vpop.xlane.xlu0 %311 }
 0x17f   : > { %544 = vpow2.f32 %v481_v13  ;;  %v323_v17 = vadd.f32 %v319_v11, %v315_v15  ;;  %v322_v18 = vadd.f32 %v318_v12, %v312_v16 }
 0x180   : > { %546 = vpow2.f32 %v480_v14 }
 0x181   : > { %v483_v19 = vmul.f32 -1.442695, %v323_v17  ;;  %v482_v20 = vmul.f32 -1.442695, %v322_v18 }
 0x183   : > { %548 = vpow2.f32 %v483_v19 }
 0x184   : > { %550 = vpow2.f32 %v482_v20 }
 0x189   : > { %v545_v21 = vpop.eup %544 }
 0x18a   : > { %v547_v22 = vpop.eup %546  ;;  %v337_v23 = vadd.f32 1.0, %v545_v21 }
 0x18b   : > { %v336_v24 = vadd.f32 1.0, %v547_v22 }
 0x18c   : > { %552 = vrcp.f32 %v337_v23 }
 0x18d   : > { %v549_v25 = vpop.eup %548  ;;  %554 = vrcp.f32 %v336_v24 }
 0x18e   : > { %v551_v26 = vpop.eup %550  ;;  %v339_v28 = vadd.f32 1.0, %v549_v25 }
 0x18f   : > { %v338_v27 = vadd.f32 1.0, %v551_v26 }
 0x191   : > { %556 = vrcp.f32 %v338_v27 }
 0x192   : > { %558 = vrcp.f32 %v339_v28 }
 0x196   : > { %v553_v29 = vpop.eup %552 }
 0x197   : > { %v555_v30 = vpop.eup %554  ;;  %355 = vperm.xlu1 %543, %v553_v29  }
 0x198   : > { %350 = vperm.xlu0 %542, %v555_v30  }
 0x19b   : > { %v557_v31 = vpop.eup %556 }
 0x19c   : > { %360 = vperm.xlu1 %543, %v557_v31   ;;  %v559_v32 = vpop.eup %558 }
 0x1a0   : > { %365 = vperm.xlu1 %543, %v559_v32  }
 0x216   : > { %v356_v33 = vpop.permute.xlu1 %355 }
 0x217   : > { %v370_v34 = vmul.f32 %v356_v33, %v819_v5  ;;  %v371_v35 = vmul.f32 %v356_v33, %v821_v6  ;;  %v351_v36 = vpop.permute.xlu0 %350 }
 0x218   : > { %v368_v37 = vmul.f32 %v351_v36, %v809_v0  ;;  %v369_v38 = vmul.f32 %v351_v36, %v811_v1 }
 0x219   : > { %378 = vst [vmem:[%s242_s26 + $0x10] sm:$0xff] %v370_v34  ;;  %379 = vst [vmem:[%s242_s26 + $0x18] sm:$0xff] %v371_v35 }
 0x21a   : > { %376 = vst [vmem:[%s242_s26] sm:$0xff] %v368_v37  ;;  %377 = vst [vmem:[%s242_s26 + $0x8] sm:$0xff] %v369_v38 }
 0x21b   : > { %v361_v39 = vpop.permute.xlu1 %360 }
 0x21c   : > { %v372_v40 = vmul.f32 %v361_v39, %v813_v2  ;;  %v373_v5 = vmul.f32 %v361_v39, %v817_v4 }
 0x21e   : > { %380 = vst [vmem:[%s242_s26 + $0x20] sm:$0xff] %v372_v40  ;;  %381 = vst [vmem:[%s242_s26 + $0x28] sm:$0xff] %v373_v5 }
 0x21f   : > { %v366_v0 = vpop.permute.xlu1 %365 }
 0x220   : > { %v374_v1 = vmul.f32 %v366_v0, %v825_v8  ;;  %v375_v2 = vmul.f32 %v366_v0, %v827_v9 }
 0x222   : > { %382 = vst [vmem:[%s242_s26 + $0x30] sm:$0xff] %v374_v1  ;;  %383 = vst [vmem:[%s242_s26 + $0x38] sm:$0xff] %v375_v2 }
 0x223   : > { %603 = shalt.err (!%p600_p2)
}
 0x224   : > { %s604_s9 = scalar_lea.hbm %s894_s14, 1024  ;;  %s608_s13 = scalar_lea.hbm %s945_s5, 2048 }
 0x225   : > { %p605_p4 = scmp.ne.s32.totalorder %s894_s14, %s604_s9  ;;  %p609_p9 = scmp.lt.u32.totalorder %s894_s14, %s945_s5 }
 0x226   : > { %p610_p1 = scmp.lt.u32.totalorder %s608_s13, %s604_s9  ;;  %p612_p6 = scmp.lt.u32.totalorder %s604_s9, %s894_s14 }
 0x227   : > { %p606_p5 = pnand %p605_p4, %p952_p11 }
 0x228   : > { %p611_p3 = por %p610_p1, %p609_p9 }
 0x229   : > { %p607_p7 = pneg %p606_p5 }
 0x22a   : > { %p613_p12 = por %p612_p6, %p611_p3 }
 0x22c   : > { %p614_p13 = pnand %p613_p12, %p607_p7 }
 0x22e   : > { %617 = shalt.err (!%p614_p13)
}
 0x22f   : > { %s663_s29 = smov 256   ;;  %s664_s25 = smov 16  }
 0x230   : > { %493 = dma.vmem_to_hbm [thread:$0]  (%p952_p11), %s889_s28, 1024, %s894_s14, %s385_s22, %s663_s29, %s663_s29, %s664_s25  }
 0x231 PF: > { %s413_s12 = sand.u32 1, %s644_s18   ;;  %p953_p8 = scmp.ne.s32.totalorder %s950_s6, 0 }
 0x232   : > { %p954_p10 = scmp.ge.s32.totalorder %s656_s21, 2  ;;  %s414_s15 = scalar_lea.sflag [#allocation4], %s413_s12 }
 0x234   : > { %p500_p0 = pnand %p954_p10, %p953_p8 }
 0x236   : > { %639 = dma.done.wait (!%p500_p0), %s414_s15, 1024  }
 0x237   : > { %641 = vsyncadd (!%p500_p0), %s414_s15, 4294966272  ;;  %p18_p2 = scmp.ge.s32.totalorder %s720_s24, 4   ;;  %s955_s18 = smov %s648_s19 }
 0x238   : > { %s956_s19 = smov %s652_s20  ;;  %s957_s20 = smov %s732_s27 }
 0x239   : > { %s958_s21 = smov %s720_s24  ;;  %20 = sbr.rel (!%p18_p2) target bundleno = 5 (0x5), region = 85 }
 0x240   :  { %419 = vsyncpa [#allocation3], 1 }
 0x241   :  { %421 = vsyncpa [#allocation3 + $0x1], 1 }
 0x242   :  { %422 = vsyncpa [#allocation4], 1 }
 0x243   :  { %424 = vsyncpa [#allocation4 + $0x1], 1 }

</bundles_post_ra>
